<compile_context>
chip_gen: v6e
topology: v6e:2x2x1
jax: 0.10.0
libtpu: 0.0.40
codegen_flags: <defaults>
</compile_context>

<pallas_src>
import jax
import jax.numpy as jnp
from jax.experimental import pallas as pl
from jax.experimental.pallas import tpu as pltpu


def vit_head_kernel(w_sm_ref, feats_ref, cls_ref, fcw_ref, fcb_ref, out_ref, acc_ref):
    """Grid = (B_tiles, F).
    w_sm_ref : (3F,) f32 in SMEM (softmaxed mixing weights)
    feats_ref: (TB, C, HW) native NCHW layout (HW on lanes)
    cls_ref  : (TB, C)
    fcw_ref  : (C, Lp), fcb_ref: (1, Lp)   (Lp = labels padded to 128)
    out_ref  : (TB, Lp)
    acc_ref  : (TB, C) f32 accumulator, persists across the F axis."""
    f_idx = pl.program_id(1)

    @pl.when(f_idx == 0)
    def _init():
        acc_ref[...] = jnp.zeros_like(acc_ref)

    feat = feats_ref[...]                                            # (TB, C, HW) native dtype
    inv_hw = 1.0 / feat.shape[-1]
    # feature.mean([2, 3]): f32-accumulated sum over the lane (HW) axis
    mean_pool = jnp.sum(feat.astype(jnp.float32), axis=-1) * inv_hw  # (TB, C)
    # feature.max(-1).values.max(-1).values: max over lanes, promote the small result
    max_pool = jnp.max(feat, axis=-1).astype(jnp.float32)            # (TB, C)
    cls_tok = cls_ref[...].astype(jnp.float32)                       # (TB, C)

    # 3 softmaxed mixing scalars for this feature (precomputed host-side)
    w_mean = w_sm_ref[3 * f_idx]
    w_max = w_sm_ref[3 * f_idx + 1]
    w_cls = w_sm_ref[3 * f_idx + 2]

    acc_ref[...] += mean_pool * w_mean + max_pool * w_max + cls_tok * w_cls

    # TODO(synk): norm=True per-stat LayerNorm branch not implemented (module default norm=False).
    # dropout(p=0.0) is identity at inference; final_fc runs once per batch tile:
    @pl.when(f_idx == pl.num_programs(1) - 1)
    def _finalize():
        out_ref[...] = (jnp.dot(acc_ref[...], fcw_ref[...],
                                preferred_element_type=jnp.float32)
                        + fcb_ref[...]).astype(out_ref.dtype)


def _pick_block_b(B, C, HW, itemsize):
    if B <= 8:
        return B                     # one tile; block dim == full B satisfies the tiling rule
    per_row = C * HW * itemsize      # one batch row of one feature map
    budget = 6 * 1024 * 1024         # per-DMA-buffer budget: safe for 16 MiB scoped VMEM (v5e)
    return max(8, min(B, budget // per_row) // 8 * 8)


def vit_classification_head_v0(features, cls_tokens, weights, fc_w, fc_b, *, block_b=None):
    """features: (F, B, C, H, W) native NCHW stack; cls_tokens: (F, B, C);
    weights: (1, 3F, 1) parameter; fc_w: (num_labels, C) PyTorch Linear layout; fc_b: (num_labels,)."""
    F, B, C, H, W = features.shape
    HW = H * W
    L = fc_b.shape[0]

    feats = features.reshape(F, B, C, HW)   # collapse of contiguous trailing dims: free, no copy

    # parameter-only preprocessing (tiny, done once, not per grid step)
    w_sm = jax.nn.softmax(weights.reshape(3 * F).astype(jnp.float32), axis=0)     # (3F,)
    Lp = ((L + 127) // 128) * 128                                                  # lane-dense store
    fcw = jnp.zeros((C, Lp), jnp.float32).at[:, :L].set(fc_w.T.astype(jnp.float32))
    fcb = jnp.zeros((1, Lp), jnp.float32).at[:, :L].set(fc_b.astype(jnp.float32)[None, :])

    if block_b is None:
        block_b = _pick_block_b(B, C, HW, feats.dtype.itemsize)

    grid = (pl.cdiv(B, block_b), F)

    out = pl.pallas_call(
        vit_head_kernel,
        out_shape=jax.ShapeDtypeStruct((B, Lp), jnp.float32),
        grid=grid,
        in_specs=[
            pl.BlockSpec(memory_space=pltpu.MemorySpace.SMEM),                  # w_sm scalars
            pl.BlockSpec((None, block_b, C, HW), lambda b, f: (f, b, 0, 0)),    # feature maps
            pl.BlockSpec((None, block_b, C), lambda b, f: (f, b, 0)),           # cls tokens
            pl.BlockSpec((C, Lp), lambda b, f: (0, 0)),                         # fc weight (resident)
            pl.BlockSpec((1, Lp), lambda b, f: (0, 0)),                         # fc bias   (resident)
        ],
        out_specs=pl.BlockSpec((block_b, Lp), lambda b, f: (b, 0)),
        scratch_shapes=[pltpu.VMEM((block_b, C), jnp.float32)],
        compiler_params=pltpu.CompilerParams(
            dimension_semantics=("parallel", "arbitrary")),
    )(w_sm, feats, cls_tokens, fcw, fcb)
    return out[:, :L]


def reference(features, cls_tokens, weights, fc_w, fc_b):
    F = features.shape[0]
    xs = []
    for i in range(F):
        f = features[i]
        xs.append(f.mean(axis=(2, 3)))
        xs.append(f.max(axis=3).max(axis=2))
        xs.append(cls_tokens[i])
    xs = jnp.stack(xs, axis=1)                 # (B, 3F, C)
    w_sm = jax.nn.softmax(weights, axis=1)     # (1, 3F, 1)
    feat = (xs * w_sm).sum(axis=1)             # (B, C)
    return feat @ fc_w.T + fc_b                # (B, num_labels)


if __name__ == "__main__":
    key = jax.random.PRNGKey(0)
    num_features, channel, num_labels = 2, 32, 16
    B, H, W = 2, 8, 8
    k1, k2, k3, k4, k5 = jax.random.split(key, 5)

    # inputs: list-of-features stacked along a leading F axis, native NCHW
    features = jax.random.normal(k1, (num_features, B, channel, H, W), jnp.float32)
    cls_tokens = jax.random.normal(k2, (num_features, B, channel), jnp.float32)

    # parameters (weights perturbed away from init-ones to exercise the softmax mixing)
    weights = (jnp.ones((1, num_features * 3, 1), jnp.float32)
               + 0.3 * jax.random.normal(k5, (1, num_features * 3, 1), jnp.float32))
    fc_w = 0.05 * jax.random.normal(k3, (num_labels, channel), jnp.float32)
    fc_b = 0.01 * jax.random.normal(k4, (num_labels,), jnp.float32)

    out = vit_classification_head_v0(features, cls_tokens, weights, fc_w, fc_b)
    out = jax.block_until_ready(out)

    ref = reference(features, cls_tokens, weights, fc_w, fc_b)
    assert out.shape == (B, num_labels), out.shape
    assert jnp.allclose(out, ref, atol=1e-5, rtol=1e-5), float(jnp.max(jnp.abs(out - ref)))
    print("KERNEL_OK")
</pallas_src>

<mosaic_0001>
module attributes {stable_mosaic.version = 11 : i64} {
  func.func @vit_head_kernel(%arg0: i32, %arg1: i32, %arg2: memref<6xf32, #tpu.memory_space<smem>>, %arg3: memref<1x2x32x64xf32, #tpu.memory_space<vmem>>, %arg4: memref<1x2x32xf32, #tpu.memory_space<vmem>>, %arg5: memref<32x128xf32, #tpu.memory_space<vmem>>, %arg6: memref<1x128xf32, #tpu.memory_space<vmem>>, %arg7: memref<2x128xf32, #tpu.memory_space<vmem>>, %arg8: memref<2x32xf32, #tpu.memory_space<vmem>>) attributes {dimension_semantics = [#tpu.dimension_semantics<parallel>, #tpu.dimension_semantics<arbitrary>], iteration_bounds = array<i64: 1, 2>, scalar_prefetch = 0 : i64, scratch_operands = 1 : i64, tpu.core_type = #tpu.core_type<tc>, window_params = [{transform_indices = @transform_0, window_bounds = array<i64: 6>}, {transform_indices = @transform_1, window_bounds = array<i64: 1, 2, 32, 64>}, {transform_indices = @transform_2, window_bounds = array<i64: 1, 2, 32>}, {pipeline_mode = #tpu.pipeline_mode<synchronous>, transform_indices = @transform_3, window_bounds = array<i64: 32, 128>}, {pipeline_mode = #tpu.pipeline_mode<synchronous>, transform_indices = @transform_4, window_bounds = array<i64: 1, 128>}, {transform_indices = @transform_5, window_bounds = array<i64: 2, 128>}]} {
    %c0_i32 = arith.constant 0 : i32
    %0 = arith.cmpi eq, %arg1, %c0_i32 : i32
    %1 = arith.extui %0 : i1 to i32
    %c0_i32_0 = arith.constant 0 : i32
    %2 = arith.cmpi ne, %1, %c0_i32_0 : i32
    scf.if %2 {
      %cst_17 = arith.constant 0.000000e+00 : f32
      %36 = vector.broadcast %cst_17 : f32 to vector<2x32xf32>
      %c0_18 = arith.constant 0 : index
      %c0_19 = arith.constant 0 : index
      %37 = vector.load %arg8[%c0_18, %c0_19] : memref<2x32xf32, #tpu.memory_space<vmem>>, vector<2x32xf32>
      tpu.vector_store %arg8[%c0_18, %c0_19], %36 {strides = array<i32>} : memref<2x32xf32, #tpu.memory_space<vmem>>, vector<2x32xf32>,
    } else {
    }
    %c0 = arith.constant 0 : index
    %c0_1 = arith.constant 0 : index
    %c0_2 = arith.constant 0 : index
    %c0_3 = arith.constant 0 : index
    %3 = vector.load %arg3[%c0, %c0_1, %c0_2, %c0_3] : memref<1x2x32x64xf32, #tpu.memory_space<vmem>>, vector<1x2x32x64xf32>
    %4 = vector.shape_cast %3 : vector<1x2x32x64xf32> to vector<2x32x64xf32>
    %cst = arith.constant dense<0.000000e+00> : vector<2x32xf32>
    %5 = vector.multi_reduction <add>, %4, %cst [2] : vector<2x32x64xf32> to vector<2x32xf32>
    %cst_4 = arith.constant 1.562500e-02 : f32
    %6 = vector.broadcast %cst_4 : f32 to vector<2x32xf32>
    %7 = arith.mulf %5, %6 : vector<2x32xf32>
    %cst_5 = arith.constant dense<0xFF800000> : vector<2x32xf32>
    %8 = vector.multi_reduction <maximumf>, %4, %cst_5 [2] : vector<2x32x64xf32> to vector<2x32xf32>
    %c0_6 = arith.constant 0 : index
    %c0_7 = arith.constant 0 : index
    %c0_8 = arith.constant 0 : index
    %9 = vector.load %arg4[%c0_6, %c0_7, %c0_8] : memref<1x2x32xf32, #tpu.memory_space<vmem>>, vector<1x2x32xf32>
    %10 = vector.shape_cast %9 : vector<1x2x32xf32> to vector<2x32xf32>
    %c3_i32 = arith.constant 3 : i32
    %11 = arith.muli %c3_i32, %arg1 : i32
    %12 = arith.index_cast %11 : i32 to index
    %13 = memref.load %arg2[%12] : memref<6xf32, #tpu.memory_space<smem>>
    %c3_i32_9 = arith.constant 3 : i32
    %14 = arith.muli %c3_i32_9, %arg1 : i32
    %c1_i32 = arith.constant 1 : i32
    %15 = arith.addi %14, %c1_i32 : i32
    %16 = arith.index_cast %15 : i32 to index
    %17 = memref.load %arg2[%16] : memref<6xf32, #tpu.memory_space<smem>>
    %c3_i32_10 = arith.constant 3 : i32
    %18 = arith.muli %c3_i32_10, %arg1 : i32
    %c2_i32 = arith.constant 2 : i32
    %19 = arith.addi %18, %c2_i32 : i32
    %20 = arith.index_cast %19 : i32 to index
    %21 = memref.load %arg2[%20] : memref<6xf32, #tpu.memory_space<smem>>
    %c0_11 = arith.constant 0 : index
    %c0_12 = arith.constant 0 : index
    %22 = vector.load %arg8[%c0_11, %c0_12] : memref<2x32xf32, #tpu.memory_space<vmem>>, vector<2x32xf32>
    %23 = vector.broadcast %13 : f32 to vector<2x32xf32>
    %24 = arith.mulf %7, %23 : vector<2x32xf32>
    %25 = vector.broadcast %17 : f32 to vector<2x32xf32>
    %26 = arith.mulf %8, %25 : vector<2x32xf32>
    %27 = arith.addf %24, %26 : vector<2x32xf32>
    %28 = vector.broadcast %21 : f32 to vector<2x32xf32>
    %29 = arith.mulf %10, %28 : vector<2x32xf32>
    %30 = arith.addf %27, %29 : vector<2x32xf32>
    %31 = arith.addf %22, %30 : vector<2x32xf32>
    %c0_13 = arith.constant 0 : index
    %c0_14 = arith.constant 0 : index
    %32 = vector.load %arg8[%c0_13, %c0_14] : memref<2x32xf32, #tpu.memory_space<vmem>>, vector<2x32xf32>
    tpu.vector_store %arg8[%c0_13, %c0_14], %31 {strides = array<i32>} : memref<2x32xf32, #tpu.memory_space<vmem>>, vector<2x32xf32>,
    %c1_i32_15 = arith.constant 1 : i32
    %33 = arith.cmpi eq, %arg1, %c1_i32_15 : i32
    %34 = arith.extui %33 : i1 to i32
    %c0_i32_16 = arith.constant 0 : i32
    %35 = arith.cmpi ne, %34, %c0_i32_16 : i32
    scf.if %35 {
      %c0_17 = arith.constant 0 : index
      %c0_18 = arith.constant 0 : index
      %36 = vector.load %arg8[%c0_17, %c0_18] : memref<2x32xf32, #tpu.memory_space<vmem>>, vector<2x32xf32>
      %c0_19 = arith.constant 0 : index
      %c0_20 = arith.constant 0 : index
      %37 = vector.load %arg5[%c0_19, %c0_20] : memref<32x128xf32, #tpu.memory_space<vmem>>, vector<32x128xf32>
      %cst_21 = arith.constant dense<0.000000e+00> : vector<2x128xf32>
      %38 = tpu.matmul %36, %37, %cst_21 {dimension_numbers = #tpu.dot_dimension_numbers<[1], [0], [0], [1], [0, 0, 1, 1], [], []>} : vector<2x32xf32>, vector<32x128xf32>, vector<2x128xf32> -> vector<2x128xf32>
      %c0_22 = arith.constant 0 : index
      %c0_23 = arith.constant 0 : index
      %39 = vector.load %arg6[%c0_22, %c0_23] : memref<1x128xf32, #tpu.memory_space<vmem>>, vector<1x128xf32>
      %40 = vector.broadcast %39 : vector<1x128xf32> to vector<2x128xf32>
      %41 = arith.addf %38, %40 : vector<2x128xf32>
      %c0_24 = arith.constant 0 : index
      %c0_25 = arith.constant 0 : index
      %42 = vector.load %arg7[%c0_24, %c0_25] : memref<2x128xf32, #tpu.memory_space<vmem>>, vector<2x128xf32>
      tpu.vector_store %arg7[%c0_24, %c0_25], %41 {strides = array<i32>} : memref<2x128xf32, #tpu.memory_space<vmem>>, vector<2x128xf32>,
    } else {
    }
    return
  }
  func.func @transform_0(%arg0: i32, %arg1: i32) -> i32 {
    %c0_i32 = arith.constant 0 : i32
    %c0_i32_0 = arith.constant 0 : i32
    return %c0_i32 : i32
  }
  func.func @transform_1(%arg0: i32, %arg1: i32) -> (i32, i32, i32, i32) {
    %c0_i32 = arith.constant 0 : i32
    %c0_i32_0 = arith.constant 0 : i32
    %c0_i32_1 = arith.constant 0 : i32
    return %arg1, %arg0, %c0_i32, %c0_i32_0 : i32, i32, i32, i32
  }
  func.func @transform_2(%arg0: i32, %arg1: i32) -> (i32, i32, i32) {
    %c0_i32 = arith.constant 0 : i32
    %c0_i32_0 = arith.constant 0 : i32
    return %arg1, %arg0, %c0_i32 : i32, i32, i32
  }
  func.func @transform_3(%arg0: i32, %arg1: i32) -> (i32, i32) {
    %c0_i32 = arith.constant 0 : i32
    %c0_i32_0 = arith.constant 0 : i32
    %c0_i32_1 = arith.constant 0 : i32
    return %c0_i32, %c0_i32_0 : i32, i32
  }
  func.func @transform_4(%arg0: i32, %arg1: i32) -> (i32, i32) {
    %c0_i32 = arith.constant 0 : i32
    %c0_i32_0 = arith.constant 0 : i32
    %c0_i32_1 = arith.constant 0 : i32
    return %c0_i32, %c0_i32_0 : i32, i32
  }
  func.func @transform_5(%arg0: i32, %arg1: i32) -> (i32, i32) {
    %c0_i32 = arith.constant 0 : i32
    %c0_i32_0 = arith.constant 0 : i32
    return %arg0, %c0_i32 : i32, i32
  }
}

</mosaic_0001>

<bundles_post_ra>
// kernel: tpu_custom_call.1
= control target key start
LH: loop header
LB: loop body
LE: loop exit
PB: predicated region body
PF: predicated region fallthrough
CT: control target
= control target key end

     0   :  { %s1354_s0 = inlined_call_operand.hbm [shape: f32[6], index: 0, kind: input, shape index: {}]   ;;  %s1355_s1 = inlined_call_operand.hbm [shape: f32[2,2,32,64], index: 1, kind: input, shape index: {}]   ;;  %s1356_s2 = inlined_call_operand.hbm [shape: f32[2,2,32], index: 2, kind: input, shape index: {}]   ;;  %s1357_s3 = inlined_call_operand.hbm [shape: f32[32,128], index: 3, kind: input, shape index: {}]   ;;  %s1358_s4 = inlined_call_operand.vmem [shape: f32[1,128], index: 4, kind: input, shape index: {}]   ;;  %s1359_s5 = inlined_call_operand.hbm [shape: f32[2,128], index: 5, kind: output, shape index: {}]  }
   0x1   :  { %1361 = sst [smem:[#allocation18_spill]] %s1354_s0 }
   0x2   :  { %1362 = sst [smem:[#allocation19_spill]] %s1355_s1 }
   0x3   :  { %1363 = sst [smem:[#allocation20_spill]] %s1357_s3 }
   0x4   :  { %10 = vsyncpa [#allocation6], 0 }
   0x5   :  { %11 = vsyncpa [#allocation4], 0 }
   0x6   :  { %13 = vsyncpa [#allocation4 + $0x1], 0 }
   0x7   :  { %14 = vsyncpa [#allocation9], 0 }
   0x8   :  { %16 = vsyncpa [#allocation9 + $0x1], 0 }
   0x9   :  { %17 = vsyncpa [#allocation5], 0  ;;  %s1137_s18 = smov 0   ;;  %s1139_s19 = smov 0  }
   0xa   :  { %s1141_s20 = smov 0   ;;  %s1143_s21 = smov 0  }
   0xb   :  { %s1145_s22 = smov 0   ;;  %s1147_s23 = smov 0  }
   0xc LB: > { %s1166_s24 = sadd.s32 4294967295, %s1094_s23   ;;  %p78_p0 = scmp.ne.s32.totalorder %s1078_s19, %s1074_s18  ;;  %s1094_s23 = sphi %s1147_s23, %s23_s23   ;;  %s1090_s22 = sphi %s1145_s22, %s1377_s22   ;;  %s1086_s21 = sphi %s1143_s21, %s1376_s21   ;;  %s1082_s20 = sphi %s1141_s20, %s1375_s20   ;;  %s1078_s19 = sphi %s1139_s19, %s1374_s19   ;;  %s1074_s18 = sphi %s1137_s18, %s1373_s18  }
   0xd   : > { %p79_p1 = scmp.eq.s32.totalorder %s1166_s24, 0  ;;  %p776_p2 = scmp.ge.s32.totalorder %s1094_s23, 1 }
   0xe   : > { %p185_p3 = scmp.lt.s32.totalorder %s1094_s23, 3  ;;  %s1096_s27 = smov [#allocation10]  }
   0xf   : > { %p1174_p4 = por %p79_p1, %p78_p0  ;;  %s206_s28 = sshll.u32 %s1096_s27, 4  ;;  %s207_s28 = int_to_ptr.vmem [resolvable:$true] %s206_s28 }
  0x10   : > { %p1178_p5 = pnand %p776_p2, %p185_p3  ;;  %s922_s30 = scalar_lea.vmem %s207_s28, 512 }
  0x11   : > { %p923_p9 = scmp.ne.s32.totalorder %s207_s28, %s922_s30  ;;  %p930_p12 = scmp.lt.s32.totalorder %s207_s28, %s207_s28 }
  0x12   : > { %p831_p6 = pneg %p1178_p5  ;;  %p931_p13 = scmp.lt.s32.totalorder %s922_s30, %s922_s30 }
  0x14   : > { %p1186_p7 = pnand %p831_p6, %p79_p1  ;;  %p932_p0 = por %p931_p13, %p930_p12 }
  0x16   : > { %p913_p8 = pneg %p1186_p7 }
  0x18   : > { %p925_p10 = pnand %p923_p9, %p913_p8 }
  0x1a   : > { %p926_p11 = pneg %p925_p10 }
  0x1c   : > { %p933_p2 = pnand %p932_p0, %p926_p11 }
  0x1e   : > { %936 = shalt.err (!%p933_p2)
}
  0x1f   : > { %s1097_s6 = smov 128   ;;  %s1098_s7 = smov 8  }
  0x20   : > { %s1367_s3 = sld [smem:[#allocation20_spill]]  ;;  %s1099_s10 = smov [#allocation3]  }
  0x21   : > { %s1368_s0 = sld [smem:[#allocation18_spill]]  ;;  %s32_s13 = sadd.s32 1, %s1090_s22 }
  0x22   : > { %s65_s14 = sadd.s32 1, %s1082_s20  ;;  %p33_p3 = scmp.ge.s32.totalorder %s32_s13, 2 }
  0x23   : > { %p72_p6 = scmp.ne.s32.totalorder %s1082_s20, %s1078_s19  ;;  %p73_p8 = scmp.eq.s32.totalorder %s1094_s23, 0 }
  0x24   : > { %p847_p9 = scmp.lt.s32.totalorder %s1094_s23, 2  ;;  %s1379_s13 = smov (%p33_p3, %s32_s13), 0 }
  0x25   : > { %1369 = sst [smem:[#allocation17_spill]] %s1379_s13  ;;  %p74_p10 = por %p73_p8, %p72_p6 }
  0x26   : > { %837 = dma.hbm_to_vmem [thread:$0]  (!%p1186_p7), %s1367_s3, 512, %s207_s28, [#allocation9], %s1097_s6, %s1097_s6, %s1098_s7  }
  0x27   : > { %834 = dma.hbm_to_smem (!%p1186_p7), %s1368_s0, 16, %s1099_s10, [#allocation6]  }
  0x28   : > { %s1214_s15 = sand.u32 1, %s1082_s20   ;;  %s60_s16 = ssub.s32 %s1090_s22, %s1379_s13 }
  0x29   : > { %p63_p11 = scmp.eq.s32.totalorder %s60_s16, 0  ;;  %s780_s17 = sshll.u32 %s1214_s15, 6 }
  0x2a   : > { %s798_s18 = sshll.u32 %s1090_s22, 10  ;;  %s1370_s1 = sld [smem:[#allocation19_spill]] }
  0x2b   : > { %s1221_s27 = scalar_select %p63_p11, %s1082_s20, %s65_s14  }
  0x2c   : > { %s227_s8 = scalar_lea.vmem [#allocation7], %s780_s17  ;;  %p1228_p7 = pnand %p847_p9, %p74_p10 }
  0x2d   : > { %s237_s9 = sshll.u32 %s227_s8, 4  ;;  %s247_s11 = sand.u32 1, %s1094_s23   ;;  %s238_s9 = int_to_ptr.vmem [resolvable:$true] %s237_s9 }
  0x2e   : > { %s783_s12 = sshll.u32 %s1214_s15, 1  ;;  %s224_s16 = scalar_lea.sflag [#allocation4], %s1214_s15 }
  0x2f   : > { %p950_p12 = pneg %p1228_p7  ;;  %s961_s14 = scalar_lea.vmem %s238_s9, 1024 }
  0x30   : > { %s236_s30 = scalar_lea.hbm %s1370_s1, %s798_s18  ;;  %p962_p13 = scmp.ne.s32.totalorder %s238_s9, %s961_s14 }
  0x31   : > { %s1100_s17 = smov [#allocation7]  }
  0x32   : > { %p964_p0 = pnand %p962_p13, %p950_p12  ;;  %s966_s18 = sshll.u32 %s1100_s17, 4  ;;  %s967_s18 = int_to_ptr.vmem [resolvable:$false] %s966_s18 }
  0x33   : > { %s968_s28 = scalar_lea.vmem %s967_s18, 2048  ;;  %p969_p3 = scmp.lt.s32.totalorder %s238_s9, %s967_s18 }
  0x34   : > { %p965_p2 = pneg %p964_p0  ;;  %p970_p6 = scmp.lt.s32.totalorder %s968_s28, %s961_s14 }
  0x36   : > { %p971_p8 = por %p970_p6, %p969_p3 }
  0x38   : > { %p972_p9 = pnand %p971_p8, %p965_p2 }
  0x3a   : > { %975 = shalt.err (!%p972_p9)
}
  0x3b   : > { %841 = dma.hbm_to_vmem [thread:$0]  (!%p1228_p7), %s236_s30, 1024, %s238_s9, %s224_s16, %s1097_s6, %s1097_s6, %s1098_s7  }
  0x3c   : > { %s784_s15 = sshll.u32 %s1090_s22, 5  ;;  %s251_s0 = scalar_lea.vmem [#allocation8], %s783_s12 }
  0x3d   : > { %s257_s17 = scalar_lea.hbm %s1356_s2, %s784_s15  ;;  %s259_s1 = sshll.u32 %s251_s0, 4  ;;  %s260_s1 = int_to_ptr.vmem [resolvable:$true] %s259_s1 }
  0x3e   : > { %s248_s14 = scalar_lea.sflag [#allocation9], %s247_s11  ;;  %s989_s18 = scalar_lea.vmem %s260_s1, 32 }
  0x3f   : > { %p990_p10 = scmp.ne.s32.totalorder %s260_s1, %s989_s18  ;;  %s1101_s28 = smov [#allocation8]  }
  0x40   : > { %s994_s3 = sshll.u32 %s1101_s28, 4  ;;  %s995_s3 = int_to_ptr.vmem [resolvable:$false] %s994_s3 }
  0x41   : > { %p992_p11 = pnand %p990_p10, %p950_p12  ;;  %s996_s13 = scalar_lea.vmem %s995_s3, 64 }
  0x42   : > { %p997_p0 = scmp.lt.s32.totalorder %s260_s1, %s995_s3  ;;  %p998_p2 = scmp.lt.s32.totalorder %s996_s13, %s989_s18 }
  0x43   : > { %p993_p13 = pneg %p992_p11 }
  0x44   : > { %p999_p3 = por %p998_p2, %p997_p0 }
  0x46   : > { %p1000_p6 = pnand %p999_p3, %p993_p13 }
  0x48   : > { %1003 = shalt.err (!%p1000_p6)
}
  0x49   : > { %844 = dma.hbm_to_vmem [thread:$0]  (!%p1228_p7), %s257_s17, 32, %s260_s1, %s248_s14  }
  0x4a   : > { %268 = sbr.rel (%p1178_p5) target bundleno = 641 (0x281), region = 40 }
  0x4f   : > { %1053 = dma.done.wait (%p79_p1), [#allocation6], 16  }
  0x50   : > { %1055 = vsyncadd (%p79_p1), [#allocation6], 4294967280  ;;  %s274_s0 = sand.u32 1, %s1078_s19  }
  0x51   : > { %s787_s3 = sshll.u32 %s274_s0, 6  ;;  %s275_s6 = scalar_lea.sflag [#allocation4], %s274_s0 }
  0x52   : > { %s1261_s7 = scalar_lea.vmem [#allocation7], %s787_s3 }
  0x53   : > { %1057 = dma.done.wait (%p1174_p4), %s275_s6, 1024  }
  0x54   : > { %1059 = vsyncadd (%p1174_p4), %s275_s6, 4294966272  ;;  %s283_s1 = sand.u32 1, %s1166_s24   ;;  %s788_s26 = sshll.u32 %s274_s0, 1 }
  0x55   : > { %s284_s13 = scalar_lea.sflag [#allocation9], %s283_s1  ;;  %s1268_s30 = scalar_lea.vmem [#allocation8], %s788_s26 }
  0x56   : > { %1061 = dma.done.wait (%p1174_p4), %s284_s13, 32  }
  0x57   : > { %1063 = vsyncadd (%p1174_p4), %s284_s13, 4294967264 }
  0x58   : > { %1065 = dma.done.wait (%p79_p1), [#allocation9], 512  }
  0x59   : > { %1067 = vsyncadd (%p79_p1), [#allocation9], 4294966784 }
  0x5a   : > { %296 = sfence }
  0x5b   : > { %p790_p5 = scmp.ne.s32.totalorder %s1086_s21, 0 }
  0x5d   : > { %323 = sbr.rel (%p790_p5) target bundleno = 100 (0x64), region = 60 }
  0x62   : > { %vm324_vm0 = vcmask 254976   ;;  %v1102_v0 = vmov 0.0  }
  0x63   : > { %325 = vst.msk [vmem:[#allocation2] sm:$0x3] %vm324_vm0, %v1102_v0 }
  0x64 PF: > { %v330_v1 = vld [vmem:[%s1261_s7 + $0x20] sm:$0xff]  ;;  %vm334_vm1 = vcmask 523264   ;;  %v331_v3 = vld [vmem:[%s1261_s7 + $0x28] sm:$0xff]  ;;  %v332_v9 = vld [vmem:[%s1261_s7 + $0x30] sm:$0xff]  ;;  %s1300_s25 = smul.u32 3, %s1086_s21  ;;  %v428_v25 = vlaneseq  ;;  %v1103_v33 = vmov 0  }
  0x65   : > { %v326_v2 = vld [vmem:[%s1261_s7] sm:$0xff]  ;;  %v347_v4 = vsel %vm334_vm1, %v330_v1, 0.0  ;;  %v327_v6 = vld [vmem:[%s1261_s7 + $0x8] sm:$0xff]  ;;  %v350_v7 = vsel %vm334_vm1, %v331_v3, 0.0  ;;  %v328_v10 = vld [vmem:[%s1261_s7 + $0x10] sm:$0xff]  ;;  %v353_v11 = vsel %vm334_vm1, %v332_v9, 0.0  ;;  %910 = vset.pattern.permute.xlu1 %v1103_v33  ;;  %909 = vset.pattern.permute.xlu0 %v1103_v33 }
  0x66   : > { %v335_v5 = vsel %vm334_vm1, %v326_v2, 0.0  ;;  %348 = vadd.xlane.f32.xlu1 %v347_v4  ;;  %v338_v8 = vsel %vm334_vm1, %v327_v6, 0.0  ;;  %v341_v12 = vsel %vm334_vm1, %v328_v10, 0.0  ;;  %v333_v13 = vld [vmem:[%s1261_s7 + $0x38] sm:$0xff]  ;;  %v370_v17 = vsel %vm334_vm1, %v327_v6, -inf  ;;  %s396_s9 = sadd.s32 2, %s1300_s25 }
  0x67   : > { %336 = vadd.xlane.f32.xlu0 %v335_v5  ;;  %v329_v14 = vld [vmem:[%s1261_s7 + $0x18] sm:$0xff]  ;;  %v356_v15 = vsel %vm334_vm1, %v333_v13, 0.0  ;;  %v367_v18 = vsel %vm334_vm1, %v326_v2, -inf  ;;  %v382_v19 = vsel %vm334_vm1, %v331_v3, -inf  ;;  %v379_v20 = vsel %vm334_vm1, %v330_v1, -inf  ;;  %s397_s10 = sld [smem:[#allocation3 + %s396_s9]] }
  0x68   : > { %v344_v16 = vsel %vm334_vm1, %v329_v14, 0.0  ;;  %v385_v21 = vsel %vm334_vm1, %v332_v9, -inf  ;;  %v373_v22 = vsel %vm334_vm1, %v328_v10, -inf  ;;  %v388_v23 = vsel %vm334_vm1, %v333_v13, -inf  ;;  %v391_v27 = vld [vmem:[%s1268_s30] sm:$0x3] }
  0x69   : > { %v376_v24 = vsel %vm334_vm1, %v329_v14, -inf  ;;  %v1308_v26 = vshrl.u32 %v428_v25, 7  ;;  %s394_s11 = sadd.s32 1, %s1300_s25  ;;  %s393_s16 = sld [smem:[#allocation3 + %s1300_s25]]  ;;  %vm525_vm2 = vcmask 130112   ;;  %vm532_vm3 = vcmask 195712  }
  0x6a   : > { %351 = vadd.xlane.f32.xlu1 %v350_v7  ;;  %s395_s12 = sld [smem:[#allocation3 + %s394_s11]]  ;;  %vm539_vm4 = vcmask 261312   ;;  %vm560_vm5 = vcmask 1041409   ;;  %vm564_vm6 = vcmask 254976   ;;  %p791_p1 = scmp.ne.s32.totalorder %s1086_s21, 1 }
  0x6b   : > { %339 = vadd.xlane.f32.xlu0 %v338_v8  ;;  %v430_v30 = vsub.s32 0, %v1308_v26  ;;  %v449_v32 = vsub.s32 1, %v1308_v26 }
  0x6d   : > { %v425_v28 = vstv %s397_s10 }
  0x6e   : > { %354 = vadd.xlane.f32.xlu1 %v353_v11  ;;  %v426_v29 = vmul.f32 %v425_v28, %v391_v27 }
  0x6f   : > { %342 = vadd.xlane.f32.xlu0 %v341_v12  ;;  %v399_v54 = vstv %s393_s16 }
  0x70   : > { %v431_v31 = vrot.slane %v426_v29, %v430_v30  ;;  %v450_v34 = vrot.slane %v426_v29, %v449_v32  ;;  %v408_v47 = vstv %s395_s12 }
  0x72   : > { %357 = vadd.xlane.f32.xlu1 %v356_v15 }
  0x73   : > { %345 = vadd.xlane.f32.xlu0 %v344_v16 }
  0x76   : > { %371 = vmax.xlane.f32.xlu1 %v370_v17 }
  0x77   : > { %368 = vmax.xlane.f32.xlu0 %v367_v18 }
  0x7a   : > { %383 = vmax.xlane.f32.xlu1 %v382_v19 }
  0x7b   : > { %380 = vmax.xlane.f32.xlu0 %v379_v20 }
  0x7e   : > { %386 = vmax.xlane.f32.xlu1 %v385_v21 }
  0x7f   : > { %374 = vmax.xlane.f32.xlu0 %v373_v22 }
  0x82   : > { %389 = vmax.xlane.f32.xlu1 %v388_v23 }
  0x83   : > { %377 = vmax.xlane.f32.xlu0 %v376_v24 }
  0x93   : > { %437 = vbcast.lane.b32.xlu1 %v431_v31, 264 }
  0x97   : > { %452 = vbcast.lane.b32.xlu1 %v450_v34, 256 }
  0x99   : > { %433 = vbcast.lane.b32.xlu0 %v431_v31, 256 }
  0x9b   : > { %456 = vbcast.lane.b32.xlu1 %v450_v34, 264 }
  0x9d   : > { %441 = vbcast.lane.b32.xlu0 %v431_v31, 272 }
  0x9f   : > { %460 = vbcast.lane.b32.xlu1 %v450_v34, 272 }
  0xa1   : > { %445 = vbcast.lane.b32.xlu0 %v431_v31, 280 }
  0xa3   : > { %464 = vbcast.lane.b32.xlu1 %v450_v34, 280 }
  0xef   : > { %v349_v35 = vpop.xlane.xlu1 %348 }
  0xf0   : > { %v337_v36 = vpop.xlane.xlu0 %336  ;;  %v363_v55 = vmul.f32 0.015625, %v349_v35 }
  0xf1   : > { %v359_v50 = vmul.f32 0.015625, %v337_v36 }
  0xf2   : > { %v404_v63 = vmul.f32 %v399_v54, %v363_v55 }
  0xf3   : > { %v352_v37 = vpop.xlane.xlu1 %351  ;;  %v400_v58 = vmul.f32 %v399_v54, %v359_v50 }
  0xf4   : > { %v340_v38 = vpop.xlane.xlu0 %339  ;;  %v364_v2 = vmul.f32 0.015625, %v352_v37 }
  0xf5   : > { %v360_v51 = vmul.f32 0.015625, %v340_v38 }
  0xf6   : > { %v405_v12 = vmul.f32 %v399_v54, %v364_v2 }
  0xf7   : > { %v355_v39 = vpop.xlane.xlu1 %354  ;;  %v401_v59 = vmul.f32 %v399_v54, %v360_v51 }
  0xf8   : > { %v343_v40 = vpop.xlane.xlu0 %342  ;;  %v365_v9 = vmul.f32 0.015625, %v355_v39 }
  0xf9   : > { %v361_v3 = vmul.f32 0.015625, %v343_v40  ;;  %v515_v40 = vand.u32 127, %v428_v25 }
  0xfa   : > { %v406_v20 = vmul.f32 %v399_v54, %v365_v9 }
  0xfb   : > { %v358_v41 = vpop.xlane.xlu1 %357  ;;  %v402_v13 = vmul.f32 %v399_v54, %v361_v3 }
  0xfc   : > { %v346_v42 = vpop.xlane.xlu0 %345  ;;  %v366_v22 = vmul.f32 0.015625, %v358_v41 }
  0xfd   : > { %v362_v14 = vmul.f32 0.015625, %v346_v42 }
  0xfe   : > { %v407_v33 = vmul.f32 %v399_v54, %v366_v22 }
  0xff   : > { %v372_v43 = vpop.xlane.xlu1 %371  ;;  %v403_v23 = vmul.f32 %v399_v54, %v362_v14 }
 0x100   : > { %v369_v44 = vpop.xlane.xlu0 %368  ;;  %v410_v52 = vmul.f32 %v408_v47, %v372_v43  ;;  %v520_v43 = vadd.s32 4294967288, %v515_v40 }
 0x101   : > { %v409_v53 = vmul.f32 %v408_v47, %v369_v44  ;;  %v527_v44 = vadd.s32 4294967280, %v515_v40 }
 0x102   : > { %v418_v61 = vadd.f32 %v410_v52, %v401_v59 }
 0x103   : > { %v384_v45 = vpop.xlane.xlu1 %383  ;;  %v417_v62 = vadd.f32 %v409_v53, %v400_v58  ;;  %v530_v50 = vsub.s32 %v527_v44, %v1308_v26 }
 0x104   : > { %v381_v46 = vpop.xlane.xlu0 %380  ;;  %v414_v6 = vmul.f32 %v408_v47, %v384_v45  ;;  %v534_v45 = vadd.s32 4294967272, %v515_v40 }
 0x105   : > { %v413_v60 = vmul.f32 %v408_v47, %v381_v46 }
 0x106   : > { %v422_v19 = vadd.f32 %v414_v6, %v405_v12  ;;  %v537_v51 = vsub.s32 %v534_v45, %v1308_v26 }
 0x107   : > { %v387_v48 = vpop.xlane.xlu1 %386  ;;  %v421_v8 = vadd.f32 %v413_v60, %v404_v63 }
 0x108   : > { %v375_v49 = vpop.xlane.xlu0 %374  ;;  %v415_v16 = vmul.f32 %v408_v47, %v387_v48  ;;  %v523_v48 = vsub.s32 %v520_v43, %v1308_v26 }
 0x109   : > { %v411_v7 = vmul.f32 %v408_v47, %v375_v49  ;;  %v518_v49 = vsub.s32 %v515_v40, %v1308_v26  ;;  %v398_v26 = vld [vmem:[#allocation2] sm:$0x3] }
 0x10a   : > { %v423_v31 = vadd.f32 %v415_v16, %v406_v20 }
 0x10b   : > { %v390_v56 = vpop.xlane.xlu1 %389  ;;  %v419_v18 = vadd.f32 %v411_v7, %v402_v13 }
 0x10c   : > { %v378_v57 = vpop.xlane.xlu0 %377  ;;  %v416_v29 = vmul.f32 %v408_v47, %v390_v56 }
 0x10d   : > { %v412_v17 = vmul.f32 %v408_v47, %v378_v57 }
 0x10e   : > { %v424_v36 = vadd.f32 %v416_v29, %v407_v33 }
 0x10f   : > { %v438_v0 = vpop.permute.xlu1 %437  ;;  %v420_v30 = vadd.f32 %v412_v17, %v403_v23 }
 0x110   : > { %v434_v1 = vpop.permute.xlu0 %433  ;;  %v475_v4 = vadd.f32 %v438_v0, %v418_v61 }
 0x111   : > { %v474_v5 = vadd.f32 %v434_v1, %v417_v62 }
 0x112   : > { %494 = vperm.xlu1 %910, %v475_v4  }
 0x113   : > { %491 = vperm.xlu0 %909, %v474_v5   ;;  %v453_v10 = vpop.permute.xlu1 %452 }
 0x114   : > { %v442_v11 = vpop.permute.xlu0 %441  ;;  %v478_v15 = vadd.f32 %v453_v10, %v421_v8 }
 0x115   : > { %v476_v24 = vadd.f32 %v442_v11, %v419_v18 }
 0x116   : > { %503 = vperm.xlu1 %910, %v478_v15  }
 0x117   : > { %v457_v21 = vpop.permute.xlu1 %456 }
 0x118   : > { %v479_v27 = vadd.f32 %v457_v21, %v422_v19  ;;  %v446_v28 = vpop.permute.xlu0 %445 }
 0x119   : > { %v477_v34 = vadd.f32 %v446_v28, %v420_v30 }
 0x11a   : > { %506 = vperm.xlu0 %909, %v479_v27   ;;  %497 = vperm.xlu1 %910, %v476_v24  }
 0x11b   : > { %v461_v32 = vpop.permute.xlu1 %460 }
 0x11c   : > { %v480_v35 = vadd.f32 %v461_v32, %v423_v31 }
 0x11e   : > { %509 = vperm.xlu0 %909, %v480_v35   ;;  %500 = vperm.xlu1 %910, %v477_v34  }
 0x11f   : > { %v465_v37 = vpop.permute.xlu1 %464 }
 0x120   : > { %v481_v38 = vadd.f32 %v465_v37, %v424_v36 }
 0x122   : > { %512 = vperm.xlu0 %909, %v481_v38  }
 0x18d   : > { %v495_v39 = vpop.permute.xlu1 %494 }
 0x18e   : > { %v492_v41 = vpop.permute.xlu0 %491  ;;  %v524_v54 = vrot.slane %v495_v39, %v523_v48 }
 0x18f   : > { %v519_v55 = vrot.slane %v492_v41, %v518_v49 }
 0x191   : > { %v504_v42 = vpop.permute.xlu1 %503  ;;  %v526_v61 = vsel %vm525_vm2, %v524_v54, %v519_v55 }
 0x192   : > { %v544_v58 = vrot.slane %v504_v42, %v518_v49 }
 0x195   : > { %v498_v46 = vpop.permute.xlu1 %497  ;;  %v507_v47 = vpop.permute.xlu0 %506 }
 0x196   : > { %v548_v25 = vrot.slane %v507_v47, %v523_v48  ;;  %v531_v56 = vrot.slane %v498_v46, %v530_v50 }
 0x198   : > { %v549_v62 = vsel %vm525_vm2, %v548_v25, %v544_v58  ;;  %v533_v0 = vsel %vm532_vm3, %v531_v56, %v526_v61 }
 0x199   : > { %v501_v52 = vpop.permute.xlu1 %500  ;;  %v510_v53 = vpop.permute.xlu0 %509 }
 0x19a   : > { %v553_v57 = vrot.slane %v510_v53, %v530_v50  ;;  %v538_v59 = vrot.slane %v501_v52, %v537_v51 }
 0x19c   : > { %v554_v1 = vsel %vm532_vm3, %v553_v57, %v549_v62  ;;  %v540_v2 = vsel %vm539_vm4, %v538_v59, %v533_v0 }
 0x19d   : > { %v513_v60 = vpop.permute.xlu0 %512 }
 0x19e   : > { %v558_v63 = vrot.slane %v513_v60, %v537_v51 }
 0x1a0   : > { %v559_v3 = vsel %vm539_vm4, %v558_v63, %v554_v1  ;;  %569 = sbr.rel (%p791_p1) target bundleno = 626 (0x272), region = 64 }
 0x1a1   : > { %v561_v4 = vsel %vm560_vm5, %v559_v3, %v540_v2 }
 0x1a2   : > { %v563_v5 = vadd.f32 %v561_v4, %v398_v26 }
 0x1a4   : > { %565 = vst.msk [vmem:[#allocation2] sm:$0x3] %vm564_vm6, %v563_v5 }
 0x1a5   : > { %v574_v6 = vld [vmem:[#allocation10 + $0x18] sm:$0xff]  ;;  %v1104_v7 = vmov 0.0   ;;  %v573_v8 = vld [vmem:[#allocation10 + $0x10] sm:$0xff]  ;;  %vm1105_vm7 = vmmov 0   ;;  %v572_v9 = vld [vmem:[#allocation10 + $0x8] sm:$0xff]  ;;  %vm582_vm8 = vcmask 261120  }
 0x1a6   : > { %804 = vmatprep.subr.mxu0 %v1104_v7  ;;  %812 = vmatprep.mubr.msk.f32.mxu0 %vm1105_vm7, %v1104_v7  ;;  %v571_v10 = vld [vmem:[#allocation10] sm:$0xff]  ;;  %v792_v12 = vld [vmem:[%s1358_s4] ss:$0 sm:$0xff] }
 0x1a7   : > { %805 = vmatpush3.msra.mxu0 %v574_v6 }
 0x1a8   : > { %806 = vmatprep.subr.mxu0 %v1104_v7 }
 0x1a9   : > { %807 = vmatpush3.msra.mxu0 %v573_v8 }
 0x1aa   : > { %808 = vmatprep.subr.mxu0 %v1104_v7 }
 0x1ab   : > { %809 = vmatpush3.msra.mxu0 %v572_v9  ;;  %v570_v11 = vld [vmem:[#allocation2] sm:$0x3] }
 0x1ac   : > { %810 = vmatprep.subr.mxu0 %v1104_v7 }
 0x1ad   : > { %811 = vmatpush3.msra.mxu0 %v571_v10 }
 0x1ae   : > { %813 = vmatmul.mubr.msk.f32.vlgmr.msra.gmra.mxu0 %vm582_vm8, %v570_v11 }
 0x26e   : > { %v652_v13 = vpop.f32.mrf.mxu0 }
 0x26f   : > { %v653_v14 = vadd.f32 %v792_v12, %v652_v13 }
 0x270   : > { %v814_v15 = vpop.f32.mrf.mxu0 }
 0x271   : > { %656 = vst [vmem:[#allocation11] sm:$0x3] %v653_v14 }
 0x272 PF: > { %p850_p4 = scmp.eq.s32.totalorder %s1166_s24, 1  ;;  %s1106_s29 = smov [#allocation11]  }
 0x273   : > { %s666_s8 = sshll.u32 %s1106_s29, 4  ;;  %s667_s8 = int_to_ptr.vmem [resolvable:$true] %s666_s8 }
 0x274   : > { %s1004_s17 = scalar_lea.vmem %s667_s8, 32  ;;  %p1011_p9 = scmp.lt.s32.totalorder %s667_s8, %s667_s8 }
 0x275   : > { %p1005_p7 = scmp.ne.s32.totalorder %s667_s8, %s1004_s17  ;;  %p1012_p10 = scmp.lt.s32.totalorder %s1004_s17, %s1004_s17 }
 0x277   : > { %p1006_p12 = pnand %p1005_p7, %p850_p4  ;;  %p1013_p11 = por %p1012_p10, %p1011_p9 }
 0x279   : > { %p1007_p8 = pneg %p1006_p12 }
 0x27b   : > { %p1014_p13 = pnand %p1013_p11, %p1007_p8 }
 0x27d   : > { %1017 = shalt.err (!%p1014_p13)
}
 0x27e   : > { %828 = dma.vmem_to_hbm [thread:$0]  (%p850_p4), %s667_s8, 32, %s1359_s5, [#allocation5]  }
 0x27f   : > { %1069 = dma.done.wait (%p850_p4), [#allocation5], 32  }
 0x280   : > { %1071 = vsyncadd (%p850_p4), [#allocation5], 4294967264 }
 0x281 PF: > { %s23_s23 = sadd.s32 1, %s1094_s23   ;;  %s1372_s28 = sld [smem:[#allocation17_spill]] }
 0x282   : > { %p20_p0 = scmp.ge.s32.totalorder %s23_s23, 4   ;;  %s1373_s18 = smov %s1078_s19 }
 0x283   : > { %s1374_s19 = smov %s1082_s20  ;;  %s1375_s20 = smov %s1221_s27 }
 0x284   : > { %s1376_s21 = smov %s1090_s22  ;;  %22 = sbr.rel (!%p20_p0) target bundleno = 12 (0xc), region = 108 }
 0x287   : > { %s1377_s22 = smov %s1372_s28 }
 0x289   :  { %679 = vsyncpa [#allocation4], 1 }
 0x28a   :  { %681 = vsyncpa [#allocation4 + $0x1], 1 }
 0x28b   :  { %682 = vsyncpa [#allocation9], 1 }
 0x28c   :  { %684 = vsyncpa [#allocation9 + $0x1], 1 }
 0x28d   :  { %685 = vsyncpa [#allocation5], 1 }
 0x28e   :  { %687 = vsyncpa [#allocation5 + $0x1], 1 }
 0x28f   :  { %688 = vsyncpa [#allocation6], 1 }
 0x290   :  { %690 = vsyncpa [#allocation6 + $0x1], 1 }

</bundles_post_ra>
